<compile_context>
chip_gen: v7x
topology: tpu7x:2x2x1
jax: 0.10.0
libtpu: 0.0.40
codegen_flags: <defaults>
</compile_context>

<pallas_src>
import math

import jax
import jax.numpy as jnp
from jax.experimental import pallas as pl
from jax.experimental.pallas import tpu as pltpu

P_STAR = 5  # len(a) - 1 from the reference script (a has 6 coefficients)


def predictor_kernel(theta_ref, x_ref, o_ref):
    """theta_ref: SMEM (P_STAR+1,) scalars; x_ref/o_ref: VMEM (TM, TN) tiles."""
    # Hoist scalar SMEM reads before the heavy vector work.
    thetas = [theta_ref[k] for k in range(P_STAR + 1)]

    x = x_ref[...]
    # Single EUP exp per element (hoisted out of the k-loop).
    e = jnp.exp(-x)

    # k = 0 term: denominator is exactly 1 -> contributes theta[0].
    result = thetas[0] + jnp.zeros_like(x)

    # Remaining terms: denom = 1 + (2*k*exp(k-3)) * exp(-x), constants folded
    # at trace time.  Exact reciprocal (approx would break the rtol check).
    for k in range(1, P_STAR + 1):
        c_k = jnp.float32(2.0 * k * math.exp(k - 3))
        result = result + thetas[k] * pl.reciprocal(1.0 + c_k * e)

    o_ref[...] = result


def predictor_forward(theta, x, *, tm=512, tn=1024):
    """Elementwise Predictor forward for x of any shape (computed in f32)."""
    orig_shape = x.shape
    flat = jnp.ravel(x).astype(jnp.float32)
    total = flat.size

    # Lane width: large multiple of 128, but never wider than needed.
    tn = min(tn, 128 * pl.cdiv(max(total, 1), 128))
    n_rows = pl.cdiv(total, tn)

    # Row tile: big (default 512) but shrunk (to a multiple of 8) for tiny
    # inputs so we don't pad a 2k-element array up to half a megabyte.
    tm = min(tm, 8 * pl.cdiv(n_rows, 8))
    n_rows_padded = tm * pl.cdiv(n_rows, tm)

    padded_total = n_rows_padded * tn
    if padded_total != total:
        flat = jnp.pad(flat, (0, padded_total - total))
    x2d = flat.reshape(n_rows_padded, tn)

    grid_spec = pltpu.PrefetchScalarGridSpec(
        num_scalar_prefetch=1,  # theta -> SMEM
        grid=(n_rows_padded // tm,),
        in_specs=[pl.BlockSpec((tm, tn), lambda i, theta_ref: (i, 0))],
        out_specs=pl.BlockSpec((tm, tn), lambda i, theta_ref: (i, 0)),
    )
    out2d = pl.pallas_call(
        predictor_kernel,
        out_shape=jax.ShapeDtypeStruct((n_rows_padded, tn), jnp.float32),
        grid_spec=grid_spec,
        compiler_params=pltpu.CompilerParams(
            dimension_semantics=("parallel",)
        ),
    )(theta.astype(jnp.float32), x2d)

    return out2d.reshape(-1)[:total].reshape(orig_shape)


def predictor_ref(theta, x):
    """Pure-JAX reference mirroring the PyTorch forward (f32)."""
    x = x.astype(jnp.float32)
    result = jnp.zeros_like(x)
    for k in range(P_STAR + 1):
        result = result + theta[k] / (1.0 + 2.0 * k * jnp.exp(-(x - k + 3)))
    return result


if __name__ == "__main__":
    key = jax.random.PRNGKey(0)
    k_theta, k_x = jax.random.split(key)

    # Deterministic parameter init matching nn.Parameter(uniform(-100, 100, p_star+1))
    theta = jax.random.uniform(
        k_theta, (P_STAR + 1,), dtype=jnp.float32, minval=-100.0, maxval=100.0
    )

    # Small input consistent with an elementwise forward pass.
    x = jax.random.normal(k_x, (2, 4, 16, 16), dtype=jnp.float32)

    out = predictor_forward(theta, x)
    out = jax.block_until_ready(out)

    # Sanity check against the pure-JAX reference.
    ref = predictor_ref(theta, x)
    assert out.shape == x.shape and out.dtype == jnp.float32
    assert jnp.allclose(out, ref, rtol=1e-5, atol=1e-4), "mismatch vs reference"

    print("KERNEL_OK")
</pallas_src>

<mosaic_0001>
module attributes {stable_mosaic.version = 11 : i64} {
  func.func @predictor_kernel(%arg0: i32, %arg1: memref<6xf32, #tpu.memory_space<smem>>, %arg2: memref<8x1024xf32, #tpu.memory_space<vmem>>, %arg3: memref<8x1024xf32, #tpu.memory_space<vmem>>) attributes {dimension_semantics = [#tpu.dimension_semantics<parallel>], iteration_bounds = array<i64: 1>, scalar_prefetch = 1 : i64, scratch_operands = 0 : i64, tpu.core_type = #tpu.core_type<tc>, window_params = [{transform_indices = @transform_0, window_bounds = array<i64: 8, 1024>}, {transform_indices = @transform_1, window_bounds = array<i64: 8, 1024>}]} {
    %c0 = arith.constant 0 : index
    %0 = memref.load %arg1[%c0] : memref<6xf32, #tpu.memory_space<smem>>
    %c1 = arith.constant 1 : index
    %1 = memref.load %arg1[%c1] : memref<6xf32, #tpu.memory_space<smem>>
    %c2 = arith.constant 2 : index
    %2 = memref.load %arg1[%c2] : memref<6xf32, #tpu.memory_space<smem>>
    %c3 = arith.constant 3 : index
    %3 = memref.load %arg1[%c3] : memref<6xf32, #tpu.memory_space<smem>>
    %c4 = arith.constant 4 : index
    %4 = memref.load %arg1[%c4] : memref<6xf32, #tpu.memory_space<smem>>
    %c5 = arith.constant 5 : index
    %5 = memref.load %arg1[%c5] : memref<6xf32, #tpu.memory_space<smem>>
    %c0_0 = arith.constant 0 : index
    %c0_1 = arith.constant 0 : index
    %6 = vector.load %arg2[%c0_0, %c0_1] : memref<8x1024xf32, #tpu.memory_space<vmem>>, vector<8x1024xf32>
    %cst = arith.constant 0.000000e+00 : f32
    %7 = vector.broadcast %cst : f32 to vector<8x1024xf32>
    %8 = arith.subf %7, %6 : vector<8x1024xf32>
    %9 = math.exp %8 : vector<8x1024xf32>
    %cst_2 = arith.constant 0.000000e+00 : f32
    %10 = vector.broadcast %cst_2 : f32 to vector<8x1024xf32>
    %11 = vector.broadcast %0 : f32 to vector<8x1024xf32>
    %12 = arith.addf %11, %10 : vector<8x1024xf32>
    %cst_3 = arith.constant 0.270670563 : f32
    %13 = vector.broadcast %cst_3 : f32 to vector<8x1024xf32>
    %14 = arith.mulf %13, %9 : vector<8x1024xf32>
    %cst_4 = arith.constant 1.000000e+00 : f32
    %15 = vector.broadcast %cst_4 : f32 to vector<8x1024xf32>
    %16 = arith.addf %15, %14 : vector<8x1024xf32>
    %17 = tpu.reciprocal %16 : vector<8x1024xf32> -> vector<8x1024xf32>
    %18 = vector.broadcast %1 : f32 to vector<8x1024xf32>
    %19 = arith.mulf %18, %17 : vector<8x1024xf32>
    %20 = arith.addf %12, %19 : vector<8x1024xf32>
    %cst_5 = arith.constant 1.4715178 : f32
    %21 = vector.broadcast %cst_5 : f32 to vector<8x1024xf32>
    %22 = arith.mulf %21, %9 : vector<8x1024xf32>
    %cst_6 = arith.constant 1.000000e+00 : f32
    %23 = vector.broadcast %cst_6 : f32 to vector<8x1024xf32>
    %24 = arith.addf %23, %22 : vector<8x1024xf32>
    %25 = tpu.reciprocal %24 : vector<8x1024xf32> -> vector<8x1024xf32>
    %26 = vector.broadcast %2 : f32 to vector<8x1024xf32>
    %27 = arith.mulf %26, %25 : vector<8x1024xf32>
    %28 = arith.addf %20, %27 : vector<8x1024xf32>
    %cst_7 = arith.constant 6.000000e+00 : f32
    %29 = vector.broadcast %cst_7 : f32 to vector<8x1024xf32>
    %30 = arith.mulf %29, %9 : vector<8x1024xf32>
    %cst_8 = arith.constant 1.000000e+00 : f32
    %31 = vector.broadcast %cst_8 : f32 to vector<8x1024xf32>
    %32 = arith.addf %31, %30 : vector<8x1024xf32>
    %33 = tpu.reciprocal %32 : vector<8x1024xf32> -> vector<8x1024xf32>
    %34 = vector.broadcast %3 : f32 to vector<8x1024xf32>
    %35 = arith.mulf %34, %33 : vector<8x1024xf32>
    %36 = arith.addf %28, %35 : vector<8x1024xf32>
    %cst_9 = arith.constant 21.746254 : f32
    %37 = vector.broadcast %cst_9 : f32 to vector<8x1024xf32>
    %38 = arith.mulf %37, %9 : vector<8x1024xf32>
    %cst_10 = arith.constant 1.000000e+00 : f32
    %39 = vector.broadcast %cst_10 : f32 to vector<8x1024xf32>
    %40 = arith.addf %39, %38 : vector<8x1024xf32>
    %41 = tpu.reciprocal %40 : vector<8x1024xf32> -> vector<8x1024xf32>
    %42 = vector.broadcast %4 : f32 to vector<8x1024xf32>
    %43 = arith.mulf %42, %41 : vector<8x1024xf32>
    %44 = arith.addf %36, %43 : vector<8x1024xf32>
    %cst_11 = arith.constant 73.890564 : f32
    %45 = vector.broadcast %cst_11 : f32 to vector<8x1024xf32>
    %46 = arith.mulf %45, %9 : vector<8x1024xf32>
    %cst_12 = arith.constant 1.000000e+00 : f32
    %47 = vector.broadcast %cst_12 : f32 to vector<8x1024xf32>
    %48 = arith.addf %47, %46 : vector<8x1024xf32>
    %49 = tpu.reciprocal %48 : vector<8x1024xf32> -> vector<8x1024xf32>
    %50 = vector.broadcast %5 : f32 to vector<8x1024xf32>
    %51 = arith.mulf %50, %49 : vector<8x1024xf32>
    %52 = arith.addf %44, %51 : vector<8x1024xf32>
    %c0_13 = arith.constant 0 : index
    %c0_14 = arith.constant 0 : index
    %53 = vector.load %arg3[%c0_13, %c0_14] : memref<8x1024xf32, #tpu.memory_space<vmem>>, vector<8x1024xf32>
    tpu.vector_store %arg3[%c0_13, %c0_14], %52 {strides = array<i32>} : memref<8x1024xf32, #tpu.memory_space<vmem>>, vector<8x1024xf32>,
    return
  }
  func.func @transform_0(%arg0: i32, %arg1: memref<6xf32, #tpu.memory_space<smem>>) -> (i32, i32) {
    %c0_i32 = arith.constant 0 : i32
    %c0_i32_0 = arith.constant 0 : i32
    return %arg0, %c0_i32 : i32, i32
  }
  func.func @transform_1(%arg0: i32, %arg1: memref<6xf32, #tpu.memory_space<smem>>) -> (i32, i32) {
    %c0_i32 = arith.constant 0 : i32
    %c0_i32_0 = arith.constant 0 : i32
    return %arg0, %c0_i32 : i32, i32
  }
}

</mosaic_0001>

<bundles_post_ra>
// kernel: tpu_custom_call.1
= control target key start
LH: loop header
LB: loop body
LE: loop exit
PB: predicated region body
PF: predicated region fallthrough
CT: control target
= control target key end

     0   :  { %s586_s0 = inlined_call_operand.hbm [shape: f32[6], index: 0, kind: input, shape index: {}]   ;;  %s587_s1 = inlined_call_operand.hbm [shape: f32[8,1024], index: 1, kind: input, shape index: {}]   ;;  %s588_s2 = inlined_call_operand.hbm [shape: f32[8,1024], index: 2, kind: output, shape index: {}]  }
   0x1   :  { %s398_s11 = scalar_lea.hbm %s586_s0, 16 }
   0x2   :  { %p399_p0 = scmp.ne.s32.totalorder %s586_s0, %s398_s11  ;;  %p402_p1 = scmp.lt.u32.totalorder %s398_s11, %s586_s0 }
   0x4   :  { %p404_p2 = pnand %p402_p1, %p399_p0 }
   0x6   :  { %407 = shalt.err (!%p404_p2)  }
   0x7   :  { %s458_s16 = smov [#allocation3]  }
   0x8   :  { %8 = dma.hbm_to_smem %s586_s0, 16, %s458_s16, [#allocation2] }
   0x9   :  { %452 = dma.done.wait [#allocation2], 16 }
   0xa   :  { %453 = vsyncadd [#allocation2], 4294967280 }
   0xb   :  { %10 = sfence }
   0xc   :  { %11 = vsyncpa [#allocation5], 0 }
   0xd   :  { %12 = vsyncpa [#allocation6], 0  ;;  %s459_s19 = smov [#allocation4]   ;;  %s408_s23 = scalar_lea.hbm %s587_s1, 1024 }
   0xe   :  { %s19_s20 = sshll.u32 %s459_s19, 4  ;;  %p409_p3 = scmp.ne.s32.totalorder %s587_s1, %s408_s23  ;;  %s20_s20 = int_to_ptr.vmem [resolvable:$true] %s19_s20 }
   0xf   :  { %p412_p4 = scmp.lt.u32.totalorder %s408_s23, %s587_s1 }
  0x11   :  { %p414_p5 = pnand %p412_p4, %p409_p3 }
  0x13   :  { %417 = shalt.err (!%p414_p5)
}
  0x14   :  { %s418_s0 = scalar_lea.vmem %s20_s20, 1024  ;;  %p423_p7 = scmp.lt.s32.totalorder %s20_s20, %s20_s20 }
  0x15   :  { %p419_p6 = scmp.ne.s32.totalorder %s20_s20, %s418_s0  ;;  %p424_p8 = scmp.lt.s32.totalorder %s418_s0, %s418_s0 }
  0x17   :  { %p425_p9 = por %p424_p8, %p423_p7 }
  0x19   :  { %p426_p10 = pnand %p425_p9, %p419_p6 }
  0x1b   :  { %429 = shalt.err (!%p426_p10)
}
  0x1c   :  { %22 = dma.hbm_to_vmem [thread:$0]  %s587_s1, 1024, %s20_s20, [#allocation5]  }
  0x1d   :  { %454 = dma.done.wait [#allocation5], 1024  }
  0x1e   :  { %455 = vsyncadd [#allocation5], 4294966272  ;;  %v32_v0 = vld [vmem:[#allocation4] sm:$0xff]  ;;  %v33_v1 = vld [vmem:[#allocation4 + $0x8] sm:$0xff]  ;;  %s26_s30 = sld [smem:[#allocation3]]  ;;  %s294_s3 = sld [smem:[#allocation3 + $0x1]] }
  0x1f   :  { %v34_v2 = vld [vmem:[#allocation4 + $0x10] sm:$0xff]  ;;  %v40_v3 = vsub.f32 0.0, %v32_v0  ;;  %v41_v4 = vsub.f32 0.0, %v33_v1  ;;  %v35_v5 = vld [vmem:[#allocation4 + $0x18] sm:$0xff]  ;;  %v36_v10 = vld [vmem:[#allocation4 + $0x20] sm:$0xff]  ;;  %s295_s4 = sld [smem:[#allocation3 + $0x2]] }
  0x20   :  { %v42_v6 = vsub.f32 0.0, %v34_v2  ;;  %v43_v9 = vsub.f32 0.0, %v35_v5  ;;  %v37_v12 = vld [vmem:[#allocation4 + $0x28] sm:$0xff]  ;;  %v38_v13 = vld [vmem:[#allocation4 + $0x30] sm:$0xff]  ;;  %s296_s1 = sld [smem:[#allocation3 + $0x3]]  ;;  %s297_s5 = sld [smem:[#allocation3 + $0x4]] }
  0x21   :  { %v48_v7 = vmul.f32 1.442695, %v40_v3  ;;  %v50_v8 = vmul.f32 1.442695, %v41_v4  ;;  %v44_v14 = vsub.f32 0.0, %v36_v10  ;;  %v39_v15 = vld [vmem:[#allocation4 + $0x38] sm:$0xff] }
  0x22   :  { %v52_v11 = vmul.f32 1.442695, %v42_v6  ;;  %s298_s6 = sld [smem:[#allocation3 + $0x5]]  ;;  %v54_v16 = vmul.f32 1.442695, %v43_v9  ;;  %v45_v17 = vsub.f32 0.0, %v37_v12 }
  0x23   :  { %302 = vpow2.f32 %v48_v7  ;;  %v46_v18 = vsub.f32 0.0, %v38_v13  ;;  %v47_v19 = vsub.f32 0.0, %v39_v15  ;;  %v56_v20 = vmul.f32 1.442695, %v44_v14  ;;  %s460_s7 = smov [#allocation7]  }
  0x24   :  { %304 = vpow2.f32 %v50_v8  ;;  %v58_v21 = vmul.f32 1.442695, %v45_v17  ;;  %v500_v24 = vstv %s26_s30  ;;  %v502_v25 = vstv %s294_s3  ;;  %s285_s8 = sshll.u32 %s460_s7, 4  ;;  %s286_s8 = int_to_ptr.vmem [resolvable:$true] %s285_s8 }
  0x25   :  { %306 = vpow2.f32 %v52_v11  ;;  %v60_v22 = vmul.f32 1.442695, %v46_v18  ;;  %v62_v23 = vmul.f32 1.442695, %v47_v19  ;;  %v504_v26 = vstv %s295_s4  ;;  %s430_s9 = scalar_lea.vmem %s286_s8, 1024  ;;  %p435_p12 = scmp.lt.s32.totalorder %s286_s8, %s286_s8 }
  0x26   :  { %308 = vpow2.f32 %v54_v16  ;;  %v506_v28 = vstv %s296_s1  ;;  %v508_v29 = vstv %s297_s5  ;;  %p431_p11 = scmp.ne.s32.totalorder %s286_s8, %s430_s9  ;;  %p436_p13 = scmp.lt.s32.totalorder %s430_s9, %s430_s9 }
  0x27   :  { %310 = vpow2.f32 %v56_v20 }
  0x28   :  { %v510_v30 = vstv %s298_s6  ;;  %312 = vpow2.f32 %v58_v21  ;;  %p437_p0 = por %p436_p13, %p435_p12 }
  0x29   :  { %314 = vpow2.f32 %v60_v22 }
  0x2a   :  { %316 = vpow2.f32 %v62_v23  ;;  %p438_p1 = pnand %p437_p0, %p431_p11 }
  0x2d   :  { %v303_v27 = vpop.eup %302 }
  0x2e   :  { %v305_v31 = vpop.eup %304  ;;  %v66_v32 = vmul.f32 0.27067056, %v303_v27  ;;  %v107_v33 = vmul.f32 1.4715178, %v303_v27  ;;  %v148_v34 = vmul.f32 6.0, %v303_v27 }
  0x2f   :  { %v189_v35 = vmul.f32 21.746254, %v303_v27  ;;  %v230_v36 = vmul.f32 73.890564, %v303_v27  ;;  %v67_v37 = vmul.f32 0.27067056, %v305_v31  ;;  %v307_v38 = vpop.eup %306 }
  0x30   :  { %v74_v39 = vadd.f32 1.0, %v66_v32  ;;  %v115_v40 = vadd.f32 1.0, %v107_v33  ;;  %v156_v41 = vadd.f32 1.0, %v148_v34  ;;  %v108_v42 = vmul.f32 1.4715178, %v305_v31  ;;  %v309_v50 = vpop.eup %308 }
  0x31   :  { %v197_v43 = vadd.f32 1.0, %v189_v35  ;;  %v238_v44 = vadd.f32 1.0, %v230_v36  ;;  %v75_v45 = vadd.f32 1.0, %v67_v37  ;;  %v149_v46 = vmul.f32 6.0, %v305_v31  ;;  %v311_v60 = vpop.eup %310 }
  0x32   :  { %318 = vrcp.f32 %v74_v39  ;;  %v116_v47 = vadd.f32 1.0, %v108_v42  ;;  %v190_v48 = vmul.f32 21.746254, %v305_v31  ;;  %v231_v49 = vmul.f32 73.890564, %v305_v31  ;;  %v313_v0 = vpop.eup %312 }
  0x33   :  { %320 = vrcp.f32 %v115_v40  ;;  %v157_v51 = vadd.f32 1.0, %v149_v46  ;;  %v68_v52 = vmul.f32 0.27067056, %v307_v38  ;;  %v109_v53 = vmul.f32 1.4715178, %v307_v38  ;;  %v512_v4 = vpop.eup %314 }
  0x34   :  { %322 = vrcp.f32 %v156_v41  ;;  %v198_v54 = vadd.f32 1.0, %v190_v48  ;;  %v239_v55 = vadd.f32 1.0, %v231_v49  ;;  %v150_v56 = vmul.f32 6.0, %v307_v38  ;;  %v514_v8 = vpop.eup %316 }
  0x35   :  { %324 = vrcp.f32 %v197_v43  ;;  %v76_v57 = vadd.f32 1.0, %v68_v52  ;;  %v117_v58 = vadd.f32 1.0, %v109_v53  ;;  %v191_v59 = vmul.f32 21.746254, %v307_v38 }
  0x36   :  { %326 = vrcp.f32 %v238_v44  ;;  %v158_v61 = vadd.f32 1.0, %v150_v56  ;;  %v232_v62 = vmul.f32 73.890564, %v307_v38  ;;  %v69_v63 = vmul.f32 0.27067056, %v309_v50 }
  0x37   :  { %328 = vrcp.f32 %v75_v45  ;;  %v199_v1 = vadd.f32 1.0, %v191_v59  ;;  %v110_v2 = vmul.f32 1.4715178, %v309_v50  ;;  %v151_v3 = vmul.f32 6.0, %v309_v50 }
  0x38   :  { %330 = vrcp.f32 %v116_v47  ;;  %v240_v5 = vadd.f32 1.0, %v232_v62  ;;  %v77_v6 = vadd.f32 1.0, %v69_v63  ;;  %v192_v7 = vmul.f32 21.746254, %v309_v50 }
  0x39   :  { %332 = vrcp.f32 %v157_v51  ;;  %v118_v9 = vadd.f32 1.0, %v110_v2  ;;  %v159_v10 = vadd.f32 1.0, %v151_v3  ;;  %v233_v11 = vmul.f32 73.890564, %v309_v50 }
  0x3a   :  { %334 = vrcp.f32 %v198_v54  ;;  %v200_v12 = vadd.f32 1.0, %v192_v7  ;;  %v70_v13 = vmul.f32 0.27067056, %v311_v60  ;;  %v111_v14 = vmul.f32 1.4715178, %v311_v60 }
  0x3b   :  { %336 = vrcp.f32 %v239_v55  ;;  %v241_v15 = vadd.f32 1.0, %v233_v11  ;;  %v152_v16 = vmul.f32 6.0, %v311_v60  ;;  %v193_v17 = vmul.f32 21.746254, %v311_v60 }
  0x3c   :  { %v319_v18 = vpop.eup %318  ;;  %338 = vrcp.f32 %v76_v57  ;;  %v78_v19 = vadd.f32 1.0, %v70_v13  ;;  %v119_v20 = vadd.f32 1.0, %v111_v14  ;;  %v234_v21 = vmul.f32 73.890564, %v311_v60 }
  0x3d   :  { %v321_v22 = vpop.eup %320  ;;  %v91_v23 = vmul.f32 %v319_v18, %v502_v25  ;;  %340 = vrcp.f32 %v117_v58  ;;  %v160_v27 = vadd.f32 1.0, %v152_v16  ;;  %v201_v31 = vadd.f32 1.0, %v193_v17 }
  0x3e   :  { %v323_v32 = vpop.eup %322  ;;  %v132_v33 = vmul.f32 %v321_v22, %v504_v26  ;;  %342 = vrcp.f32 %v158_v61  ;;  %v242_v34 = vadd.f32 1.0, %v234_v21  ;;  %v71_v35 = vmul.f32 0.27067056, %v313_v0 }
  0x3f   :  { %v325_v36 = vpop.eup %324  ;;  %v99_v37 = vadd.f32 %v91_v23, %v500_v24  ;;  %v173_v38 = vmul.f32 %v323_v32, %v506_v28  ;;  %344 = vrcp.f32 %v199_v1  ;;  %v112_v39 = vmul.f32 1.4715178, %v313_v0 }
  0x40   :  { %v327_v40 = vpop.eup %326  ;;  %v214_v41 = vmul.f32 %v325_v36, %v508_v29  ;;  %346 = vrcp.f32 %v240_v5  ;;  %v79_v42 = vadd.f32 1.0, %v71_v35  ;;  %v153_v43 = vmul.f32 6.0, %v313_v0 }
  0x41   :  { %v329_v44 = vpop.eup %328  ;;  %v140_v45 = vadd.f32 %v132_v33, %v99_v37  ;;  %v255_v46 = vmul.f32 %v327_v40, %v510_v30  ;;  %348 = vrcp.f32 %v77_v6  ;;  %v120_v47 = vadd.f32 1.0, %v112_v39 }
  0x42   :  { %v331_v48 = vpop.eup %330  ;;  %v92_v49 = vmul.f32 %v329_v44, %v502_v25  ;;  %350 = vrcp.f32 %v118_v9  ;;  %v161_v50 = vadd.f32 1.0, %v153_v43  ;;  %v194_v51 = vmul.f32 21.746254, %v313_v0 }
  0x43   :  { %v333_v52 = vpop.eup %332  ;;  %v181_v53 = vadd.f32 %v173_v38, %v140_v45  ;;  %v133_v54 = vmul.f32 %v331_v48, %v504_v26  ;;  %352 = vrcp.f32 %v159_v10  ;;  %v235_v55 = vmul.f32 73.890564, %v313_v0 }
  0x44   :  { %v335_v56 = vpop.eup %334  ;;  %v100_v57 = vadd.f32 %v92_v49, %v500_v24  ;;  %v174_v58 = vmul.f32 %v333_v52, %v506_v28  ;;  %354 = vrcp.f32 %v200_v12  ;;  %v202_v59 = vadd.f32 1.0, %v194_v51 }
  0x45   :  { %v337_v60 = vpop.eup %336  ;;  %v222_v61 = vadd.f32 %v214_v41, %v181_v53  ;;  %v215_v62 = vmul.f32 %v335_v56, %v508_v29  ;;  %356 = vrcp.f32 %v241_v15  ;;  %v243_v63 = vadd.f32 1.0, %v235_v55 }
  0x46   :  { %v339_v1 = vpop.eup %338  ;;  %v141_v2 = vadd.f32 %v133_v54, %v100_v57  ;;  %v256_v3 = vmul.f32 %v337_v60, %v510_v30  ;;  %358 = vrcp.f32 %v78_v19  ;;  %v72_v0 = vmul.f32 0.27067056, %v512_v4 }
  0x47   :  { %v341_v5 = vpop.eup %340  ;;  %v263_v6 = vadd.f32 %v255_v46, %v222_v61  ;;  %v93_v7 = vmul.f32 %v339_v1, %v502_v25  ;;  %360 = vrcp.f32 %v119_v20  ;;  %v113_v9 = vmul.f32 1.4715178, %v512_v4 }
  0x48   :  { %v343_v10 = vpop.eup %342  ;;  %v182_v11 = vadd.f32 %v174_v58, %v141_v2  ;;  %v134_v12 = vmul.f32 %v341_v5, %v504_v26  ;;  %362 = vrcp.f32 %v160_v27  ;;  %v80_v13 = vadd.f32 1.0, %v72_v0 }
  0x49   :  { %v345_v14 = vpop.eup %344  ;;  %271 = vst [vmem:[#allocation7] sm:$0xff] %v263_v6  ;;  %v101_v15 = vadd.f32 %v93_v7, %v500_v24  ;;  %v175_v16 = vmul.f32 %v343_v10, %v506_v28  ;;  %364 = vrcp.f32 %v201_v31  ;;  %v121_v17 = vadd.f32 1.0, %v113_v9 }
  0x4a   :  { %v347_v18 = vpop.eup %346  ;;  %v223_v19 = vadd.f32 %v215_v62, %v182_v11  ;;  %v216_v20 = vmul.f32 %v345_v14, %v508_v29  ;;  %366 = vrcp.f32 %v242_v34  ;;  %v154_v21 = vmul.f32 6.0, %v512_v4 }
  0x4b   :  { %v349_v22 = vpop.eup %348  ;;  %v142_v23 = vadd.f32 %v134_v12, %v101_v15  ;;  %v257_v27 = vmul.f32 %v347_v18, %v510_v30  ;;  %368 = vrcp.f32 %v79_v42  ;;  %v195_v32 = vmul.f32 21.746254, %v512_v4 }
  0x4c   :  { %v351_v33 = vpop.eup %350  ;;  %v264_v35 = vadd.f32 %v256_v3, %v223_v19  ;;  %v94_v36 = vmul.f32 %v349_v22, %v502_v25  ;;  %370 = vrcp.f32 %v120_v47  ;;  %v162_v31 = vadd.f32 1.0, %v154_v21 }
  0x4d   :  { %v353_v37 = vpop.eup %352  ;;  %v183_v38 = vadd.f32 %v175_v16, %v142_v23  ;;  %v135_v39 = vmul.f32 %v351_v33, %v504_v26  ;;  %372 = vrcp.f32 %v161_v50  ;;  %v203_v34 = vadd.f32 1.0, %v195_v32 }
  0x4e   :  { %v355_v40 = vpop.eup %354  ;;  %272 = vst [vmem:[#allocation7 + $0x8] sm:$0xff] %v264_v35  ;;  %v102_v41 = vadd.f32 %v94_v36, %v500_v24  ;;  %v176_v42 = vmul.f32 %v353_v37, %v506_v28  ;;  %374 = vrcp.f32 %v202_v59  ;;  %v236_v43 = vmul.f32 73.890564, %v512_v4 }
  0x4f   :  { %v357_v44 = vpop.eup %356  ;;  %v224_v45 = vadd.f32 %v216_v20, %v183_v38  ;;  %v217_v46 = vmul.f32 %v355_v40, %v508_v29  ;;  %376 = vrcp.f32 %v243_v63  ;;  %v73_v47 = vmul.f32 0.27067056, %v514_v8 }
  0x50   :  { %v359_v48 = vpop.eup %358  ;;  %v143_v49 = vadd.f32 %v135_v39, %v102_v41  ;;  %v258_v50 = vmul.f32 %v357_v44, %v510_v30  ;;  %378 = vrcp.f32 %v80_v13  ;;  %v244_v51 = vadd.f32 1.0, %v236_v43 }
  0x51   :  { %v361_v52 = vpop.eup %360  ;;  %v265_v53 = vadd.f32 %v257_v27, %v224_v45  ;;  %v95_v54 = vmul.f32 %v359_v48, %v502_v25  ;;  %380 = vrcp.f32 %v121_v17  ;;  %v81_v55 = vadd.f32 1.0, %v73_v47 }
  0x52   :  { %v363_v4 = vpop.eup %362  ;;  %v184_v56 = vadd.f32 %v176_v42, %v143_v49  ;;  %v136_v57 = vmul.f32 %v361_v52, %v504_v26  ;;  %382 = vrcp.f32 %v162_v31  ;;  %v114_v58 = vmul.f32 1.4715178, %v514_v8 }
  0x53   :  { %v365_v59 = vpop.eup %364  ;;  %273 = vst [vmem:[#allocation7 + $0x10] sm:$0xff] %v265_v53  ;;  %v103_v60 = vadd.f32 %v95_v54, %v500_v24  ;;  %v177_v61 = vmul.f32 %v363_v4, %v506_v28  ;;  %384 = vrcp.f32 %v203_v34  ;;  %v155_v62 = vmul.f32 6.0, %v514_v8 }
  0x54   :  { %v367_v63 = vpop.eup %366  ;;  %v225_v1 = vadd.f32 %v217_v46, %v184_v56  ;;  %v218_v2 = vmul.f32 %v365_v59, %v508_v29  ;;  %386 = vrcp.f32 %v244_v51  ;;  %v122_v3 = vadd.f32 1.0, %v114_v58 }
  0x55   :  { %v369_v0 = vpop.eup %368  ;;  %v144_v5 = vadd.f32 %v136_v57, %v103_v60  ;;  %v259_v6 = vmul.f32 %v367_v63, %v510_v30  ;;  %388 = vrcp.f32 %v81_v55  ;;  %v163_v7 = vadd.f32 1.0, %v155_v62 }
  0x56   :  { %v371_v9 = vpop.eup %370  ;;  %v266_v10 = vadd.f32 %v258_v50, %v225_v1  ;;  %v96_v11 = vmul.f32 %v369_v0, %v502_v25  ;;  %390 = vrcp.f32 %v122_v3  ;;  %v196_v12 = vmul.f32 21.746254, %v514_v8 }
  0x57   :  { %v373_v13 = vpop.eup %372  ;;  %v185_v14 = vadd.f32 %v177_v61, %v144_v5  ;;  %v137_v15 = vmul.f32 %v371_v9, %v504_v26  ;;  %392 = vrcp.f32 %v163_v7  ;;  %v237_v16 = vmul.f32 73.890564, %v514_v8 }
  0x58   :  { %v375_v17 = vpop.eup %374  ;;  %274 = vst [vmem:[#allocation7 + $0x18] sm:$0xff] %v266_v10  ;;  %v104_v18 = vadd.f32 %v96_v11, %v500_v24  ;;  %v178_v19 = vmul.f32 %v373_v13, %v506_v28  ;;  %v204_v20 = vadd.f32 1.0, %v196_v12 }
  0x59   :  { %v377_v21 = vpop.eup %376  ;;  %v226_v22 = vadd.f32 %v218_v2, %v185_v14  ;;  %v245_v23 = vadd.f32 1.0, %v237_v16  ;;  %v219_v33 = vmul.f32 %v375_v17, %v508_v29 }
  0x5a   :  { %v379_v27 = vpop.eup %378  ;;  %v145_v32 = vadd.f32 %v137_v15, %v104_v18  ;;  %394 = vrcp.f32 %v204_v20  ;;  %v260_v38 = vmul.f32 %v377_v21, %v510_v30 }
  0x5b   :  { %v381_v35 = vpop.eup %380  ;;  %v267_v36 = vadd.f32 %v259_v6, %v226_v22  ;;  %v97_v31 = vmul.f32 %v379_v27, %v502_v25  ;;  %396 = vrcp.f32 %v245_v23 }
  0x5c   :  { %v383_v8 = vpop.eup %382  ;;  %v186_v37 = vadd.f32 %v178_v19, %v145_v32  ;;  %v138_v39 = vmul.f32 %v381_v35, %v504_v26 }
  0x5d   :  { %v385_v34 = vpop.eup %384  ;;  %275 = vst [vmem:[#allocation7 + $0x20] sm:$0xff] %v267_v36  ;;  %v105_v40 = vadd.f32 %v97_v31, %v500_v24  ;;  %v179_v41 = vmul.f32 %v383_v8, %v506_v28 }
  0x5e   :  { %v387_v42 = vpop.eup %386  ;;  %v227_v43 = vadd.f32 %v219_v33, %v186_v37  ;;  %v220_v46 = vmul.f32 %v385_v34, %v508_v29 }
  0x5f   :  { %v389_v44 = vpop.eup %388  ;;  %v146_v45 = vadd.f32 %v138_v39, %v105_v40  ;;  %v261_v52 = vmul.f32 %v387_v42, %v510_v30 }
  0x60   :  { %v391_v47 = vpop.eup %390  ;;  %v268_v48 = vadd.f32 %v260_v38, %v227_v43  ;;  %v98_v49 = vmul.f32 %v389_v44, %v502_v25 }
  0x61   :  { %v393_v50 = vpop.eup %392  ;;  %v187_v51 = vadd.f32 %v179_v41, %v146_v45  ;;  %v139_v53 = vmul.f32 %v391_v47, %v504_v26 }
  0x62   :  { %276 = vst [vmem:[#allocation7 + $0x28] sm:$0xff] %v268_v48  ;;  %v106_v54 = vadd.f32 %v98_v49, %v500_v24  ;;  %v180_v55 = vmul.f32 %v393_v50, %v506_v28 }
  0x63   :  { %v228_v4 = vadd.f32 %v220_v46, %v187_v51 }
  0x64   :  { %v395_v56 = vpop.eup %394  ;;  %v147_v57 = vadd.f32 %v139_v53, %v106_v54 }
  0x65   :  { %v397_v58 = vpop.eup %396  ;;  %v269_v59 = vadd.f32 %v261_v52, %v228_v4  ;;  %v221_v60 = vmul.f32 %v395_v56, %v508_v29 }
  0x66   :  { %v188_v61 = vadd.f32 %v180_v55, %v147_v57  ;;  %v262_v25 = vmul.f32 %v397_v58, %v510_v30 }
  0x67   :  { %277 = vst [vmem:[#allocation7 + $0x30] sm:$0xff] %v269_v59 }
  0x68   :  { %v229_v62 = vadd.f32 %v221_v60, %v188_v61 }
  0x6a   :  { %v270_v26 = vadd.f32 %v262_v25, %v229_v62 }
  0x6c   :  { %278 = vst [vmem:[#allocation7 + $0x38] sm:$0xff] %v270_v26 }
  0x6d   :  { %441 = shalt.err (!%p438_p1)
}
  0x6e   :  { %s442_s12 = scalar_lea.hbm %s588_s2, 1024 }
  0x6f   :  { %p443_p2 = scmp.ne.s32.totalorder %s588_s2, %s442_s12  ;;  %p446_p3 = scmp.lt.u32.totalorder %s442_s12, %s588_s2 }
  0x71   :  { %p448_p4 = pnand %p446_p3, %p443_p2 }
  0x73   :  { %451 = shalt.err (!%p448_p4)
}
  0x74   :  { %288 = dma.vmem_to_hbm [thread:$0]  %s286_s8, 1024, %s588_s2, [#allocation6]  }
  0x75   :  { %456 = dma.done.wait [#allocation6], 1024  }
  0x76   :  { %457 = vsyncadd [#allocation6], 4294966272 }
  0x77   :  { %292 = vsyncpa [#allocation5], 1 }
  0x78   :  { %293 = vsyncpa [#allocation6], 1 }

</bundles_post_ra>
